<compile_context>
chip_gen: v5e
topology: v5e:2x2
jax: 0.10.0
libtpu: 0.0.40
codegen_flags: <defaults>
</compile_context>

<pallas_src>
import functools
import math

import jax
import jax.numpy as jnp
from jax.experimental import pallas as pl
from jax.experimental.pallas import tpu as pltpu


def _mha_kernel(x_q_ref, x_kv_ref, wq_ref, wkv_ref, wo_ref, bo_ref, o_ref,
                *, num_heads, k_dim, v_dim):
    # x_q_ref : (TQ, D)              query rows of this grid step (batch squeezed)
    # x_kv_ref: (S,  D)              full sequence for K/V (fetched once per batch)
    # wq_ref  : (H*dk, D)            wkv_ref: (H*(dk+dv), D)   [W_k ; W_v] fused
    # wo_ref  : (D, H*dv)            bo_ref : (1, D)
    H, DK, DV = num_heads, k_dim, v_dim
    TQ = x_q_ref.shape[0]
    S = x_kv_ref.shape[0]
    cdt = x_q_ref.dtype                      # MXU operand dtype (bf16 fast path)
    dn = (((1,), (1,)), ((), ()))            # contract feature dims: y = x @ W.T

    x_q = x_q_ref[...]
    x_kv = x_kv_ref[...]

    # ---- Q projection for this query tile; fold 1/sqrt(dk) into q here
    #      (TQ*H*dk multiplies instead of H*TQ*S on the score tiles).
    q = jax.lax.dot_general(x_q, wq_ref[...], dn,
                            preferred_element_type=jnp.float32)       # (TQ, H*dk) f32
    q = q * (1.0 / math.sqrt(DK))

    # ---- fused K/V projection from the full sequence: one wide matmul.
    kv = jax.lax.dot_general(x_kv, wkv_ref[...], dn,
                             preferred_element_type=jnp.float32)      # (S, H*(dk+dv)) f32
    k = kv[:, : H * DK]
    v = kv[:, H * DK:]

    # ---- head-batched (H, rows, d) layout: one batched contraction per stage,
    #      no per-head Python loop, no concat.
    qh = jnp.transpose(q.reshape(TQ, H, DK), (1, 0, 2)).astype(cdt)   # (H, TQ, dk)
    kh = jnp.transpose(k.reshape(S, H, DK), (1, 0, 2)).astype(cdt)    # (H, S,  dk)
    vh = jnp.transpose(v.reshape(S, H, DV), (1, 0, 2)).astype(cdt)    # (H, S,  dv)

    scores = jnp.einsum('hqd,hkd->hqk', qh, kh,
                        preferred_element_type=jnp.float32)           # (H, TQ, S) f32
    # TODO(synk): optional `mask` argument (masked_fill(mask==0, -1e9)) is not wired
    #             in; this implements the mask=None path of the PyTorch forward.

    # Softmax in f32 (v5e has no bf16 VPU/EUP); denominator via EUP approx recip.
    m = jnp.max(scores, axis=-1, keepdims=True)
    p = jnp.exp(scores - m)
    l = jnp.sum(p, axis=-1, keepdims=True)
    p = p * pl.reciprocal(l, approx=True)

    attn = jnp.einsum('hqk,hkd->hqd', p.astype(cdt), vh,
                      preferred_element_type=jnp.float32)             # (H, TQ, dv) f32

    # Head "concat" == permute + view in torch: (H, TQ, dv) -> (TQ, H*dv).
    concat = jnp.transpose(attn, (1, 0, 2)).reshape(TQ, H * DV).astype(cdt)

    # Output projection with bias (again contracting the shared dim, no .T).
    out = jax.lax.dot_general(concat, wo_ref[...], dn,
                              preferred_element_type=jnp.float32)     # (TQ, D) f32
    out = out + bo_ref[...].astype(jnp.float32)
    o_ref[...] = out.astype(o_ref.dtype)


def multi_head_attention(x, wq, wk, wv, wo, bo, *, num_heads, k_dim, v_dim,
                         q_tile=256):
    """Fused MHA forward. x: (B, S, D); weights follow nn.Linear (out, in)."""
    B, S, D = x.shape
    HDK = num_heads * k_dim
    HDV = num_heads * v_dim
    assert wq.shape == (HDK, D) and wk.shape == (HDK, D)
    assert wv.shape == (HDV, D) and wo.shape == (D, HDV) and bo.shape == (D,)

    # Fuse K and V projection weights host-side -> one wide (S,D)x(D,H*(dk+dv))
    # matmul per batch (wider MXU N dim, x operand loaded once).
    wkv = jnp.concatenate([wk, wv], axis=0)            # (H*(dk+dv), D)
    bo2d = bo.reshape(1, D)

    # Query-tile the sequence so the f32 score tile is (H, TQ, S), not H*(S,S).
    tq = S if S <= q_tile else q_tile                  # full dim or multiple of 8
    nq = pl.cdiv(S, tq)

    kernel = functools.partial(_mha_kernel, num_heads=num_heads,
                               k_dim=k_dim, v_dim=v_dim)

    # NOTE: weight BlockSpecs have constant index_maps, so their blocks are only
    # DMA'd on the first grid step.  For real T5 dims, consider loading them via
    # memory_space=pl.ANY + a one-time copy to drop the idle second buffer
    # (important on v7x's 64 MiB VMEM).  For D >= 128 (real T5) the output block
    # is lane-dense; at this toy D=32 the partial store is unavoidable.
    return pl.pallas_call(
        kernel,
        out_shape=jax.ShapeDtypeStruct((B, S, D), x.dtype),
        grid_spec=pltpu.PrefetchScalarGridSpec(
            num_scalar_prefetch=0,
            grid=(B, nq),
            in_specs=[
                pl.BlockSpec((None, tq, D), lambda b, i: (b, i, 0)),   # q rows
                pl.BlockSpec((None, S, D), lambda b, i: (b, 0, 0)),    # full seq (K/V)
                pl.BlockSpec((HDK, D), lambda b, i: (0, 0)),           # Wq
                pl.BlockSpec((HDK + HDV, D), lambda b, i: (0, 0)),     # [Wk;Wv]
                pl.BlockSpec((D, HDV), lambda b, i: (0, 0)),           # Wo
                pl.BlockSpec((1, D), lambda b, i: (0, 0)),             # bo
            ],
            out_specs=pl.BlockSpec((None, tq, D), lambda b, i: (b, i, 0)),
        ),
        compiler_params=pltpu.CompilerParams(
            dimension_semantics=("parallel", "parallel")),
    )(x, x, wq, wkv, wo, bo2d)


def reference_mha(x, wq, wk, wv, wo, bo, *, num_heads, k_dim, v_dim):
    """Plain-JAX transcription of the PyTorch forward (mask=None), f32."""
    B, S, D = x.shape
    q = (x @ wq.T).reshape(B, S, num_heads, k_dim).transpose(0, 2, 1, 3)
    k = (x @ wk.T).reshape(B, S, num_heads, k_dim).transpose(0, 2, 3, 1)
    v = (x @ wv.T).reshape(B, S, num_heads, v_dim).transpose(0, 2, 1, 3)
    attn = jnp.matmul(q, k) / math.sqrt(k_dim)
    attn = jax.nn.softmax(attn, axis=-1)
    out = jnp.matmul(attn, v).transpose(0, 2, 1, 3).reshape(B, S, num_heads * v_dim)
    return out @ wo.T + bo


if __name__ == "__main__":
    # Small shapes consistent with the module's forward.
    B, S, D = 2, 8, 32          # batch, seq_len, in_dim
    H, DK, DV = 4, 8, 8         # num_heads, k_dim, v_dim

    key = jax.random.PRNGKey(0)
    kx, k1, k2, k3, k4, k5 = jax.random.split(key, 6)

    x = jax.random.normal(kx, (B, S, D), dtype=jnp.float32)
    wq = jax.random.normal(k1, (H * DK, D), dtype=jnp.float32) * 0.1
    wk = jax.random.normal(k2, (H * DK, D), dtype=jnp.float32) * 0.1
    wv = jax.random.normal(k3, (H * DV, D), dtype=jnp.float32) * 0.1
    wo = jax.random.normal(k4, (D, H * DV), dtype=jnp.float32) * 0.1
    bo = jax.random.normal(k5, (D,), dtype=jnp.float32) * 0.1

    ref = reference_mha(x, wq, wk, wv, wo, bo, num_heads=H, k_dim=DK, v_dim=DV)

    # f32 path (tolerance loosened slightly for the approx EUP reciprocal).
    out = multi_head_attention(x, wq, wk, wv, wo, bo,
                               num_heads=H, k_dim=DK, v_dim=DV)
    out = jax.block_until_ready(out)
    assert out.shape == (B, S, D)
    assert jnp.allclose(out, ref, atol=5e-3, rtol=5e-3), "f32 mismatch vs reference"

    # bf16 MXU fast path (operands bf16, accumulation + softmax in f32).
    bf = jnp.bfloat16
    out_bf16 = multi_head_attention(x.astype(bf), wq.astype(bf), wk.astype(bf),
                                    wv.astype(bf), wo.astype(bf), bo.astype(bf),
                                    num_heads=H, k_dim=DK, v_dim=DV)
    out_bf16 = jax.block_until_ready(out_bf16)
    assert jnp.allclose(out_bf16.astype(jnp.float32), ref, atol=5e-2, rtol=5e-2), \
        "bf16 mismatch vs reference"

    print("KERNEL_OK")
</pallas_src>

<mosaic_0001>
module attributes {stable_mosaic.version = 11 : i64} {
  func.func @_mha_kernel(%arg0: i32, %arg1: i32, %arg2: memref<1x8x32xf32, #tpu.memory_space<vmem>>, %arg3: memref<1x8x32xf32, #tpu.memory_space<vmem>>, %arg4: memref<32x32xf32, #tpu.memory_space<vmem>>, %arg5: memref<64x32xf32, #tpu.memory_space<vmem>>, %arg6: memref<32x32xf32, #tpu.memory_space<vmem>>, %arg7: memref<1x32xf32, #tpu.memory_space<vmem>>, %arg8: memref<1x8x32xf32, #tpu.memory_space<vmem>>) attributes {dimension_semantics = [#tpu.dimension_semantics<parallel>, #tpu.dimension_semantics<parallel>], iteration_bounds = array<i64: 2, 1>, scalar_prefetch = 0 : i64, scratch_operands = 0 : i64, tpu.core_type = #tpu.core_type<tc>, window_params = [{transform_indices = @transform_0, window_bounds = array<i64: 1, 8, 32>}, {transform_indices = @transform_1, window_bounds = array<i64: 1, 8, 32>}, {pipeline_mode = #tpu.pipeline_mode<synchronous>, transform_indices = @transform_2, window_bounds = array<i64: 32, 32>}, {pipeline_mode = #tpu.pipeline_mode<synchronous>, transform_indices = @transform_3, window_bounds = array<i64: 64, 32>}, {pipeline_mode = #tpu.pipeline_mode<synchronous>, transform_indices = @transform_4, window_bounds = array<i64: 32, 32>}, {pipeline_mode = #tpu.pipeline_mode<synchronous>, transform_indices = @transform_5, window_bounds = array<i64: 1, 32>}, {transform_indices = @transform_6, window_bounds = array<i64: 1, 8, 32>}]} {
    %c0 = arith.constant 0 : index
    %c0_0 = arith.constant 0 : index
    %c0_1 = arith.constant 0 : index
    %0 = vector.load %arg2[%c0, %c0_0, %c0_1] : memref<1x8x32xf32, #tpu.memory_space<vmem>>, vector<1x8x32xf32>
    %1 = vector.shape_cast %0 : vector<1x8x32xf32> to vector<8x32xf32>
    %c0_2 = arith.constant 0 : index
    %c0_3 = arith.constant 0 : index
    %c0_4 = arith.constant 0 : index
    %2 = vector.load %arg3[%c0_2, %c0_3, %c0_4] : memref<1x8x32xf32, #tpu.memory_space<vmem>>, vector<1x8x32xf32>
    %3 = vector.shape_cast %2 : vector<1x8x32xf32> to vector<8x32xf32>
    %c0_5 = arith.constant 0 : index
    %c0_6 = arith.constant 0 : index
    %4 = vector.load %arg4[%c0_5, %c0_6] : memref<32x32xf32, #tpu.memory_space<vmem>>, vector<32x32xf32>
    %cst = arith.constant dense<0.000000e+00> : vector<8x32xf32>
    %5 = tpu.matmul %1, %4, %cst {dimension_numbers = #tpu.dot_dimension_numbers<[1], [1], [0], [0], [0, 0, 1, 0], [], []>} : vector<8x32xf32>, vector<32x32xf32>, vector<8x32xf32> -> vector<8x32xf32>
    %cst_7 = arith.constant 0.353553385 : f32
    %6 = vector.broadcast %cst_7 : f32 to vector<8x32xf32>
    %7 = arith.mulf %5, %6 : vector<8x32xf32>
    %c0_8 = arith.constant 0 : index
    %c0_9 = arith.constant 0 : index
    %8 = vector.load %arg5[%c0_8, %c0_9] : memref<64x32xf32, #tpu.memory_space<vmem>>, vector<64x32xf32>
    %cst_10 = arith.constant dense<0.000000e+00> : vector<8x64xf32>
    %9 = tpu.matmul %3, %8, %cst_10 {dimension_numbers = #tpu.dot_dimension_numbers<[1], [1], [0], [0], [0, 0, 1, 0], [], []>} : vector<8x32xf32>, vector<64x32xf32>, vector<8x64xf32> -> vector<8x64xf32>
    %10 = vector.extract_strided_slice %9 {offsets = [0, 0], sizes = [8, 32], strides = [1, 1]} : vector<8x64xf32> to vector<8x32xf32>
    %11 = vector.extract_strided_slice %9 {offsets = [0, 32], sizes = [8, 32], strides = [1, 1]} : vector<8x64xf32> to vector<8x32xf32>
    %12 = vector.shape_cast %7 : vector<8x32xf32> to vector<8x4x8xf32>
    %13 = tpu.transpose %12, [1, 0, 2] : vector<8x4x8xf32> -> vector<4x8x8xf32>
    %14 = vector.shape_cast %10 : vector<8x32xf32> to vector<8x4x8xf32>
    %15 = tpu.transpose %14, [1, 0, 2] : vector<8x4x8xf32> -> vector<4x8x8xf32>
    %16 = vector.shape_cast %11 : vector<8x32xf32> to vector<8x4x8xf32>
    %17 = tpu.transpose %16, [1, 0, 2] : vector<8x4x8xf32> -> vector<4x8x8xf32>
    "tpu.trace_start"() <{level = 10 : i32, message = "hqd,hkd->hqk"}> : () -> ()
    %cst_11 = arith.constant dense<0.000000e+00> : vector<4x8x8xf32>
    %18 = tpu.matmul %13, %15, %cst_11 {dimension_numbers = #tpu.dot_dimension_numbers<[2], [2], [1], [1], [0, 0, 0, 1, 1, 1], [0], [0]>} : vector<4x8x8xf32>, vector<4x8x8xf32>, vector<4x8x8xf32> -> vector<4x8x8xf32>
    "tpu.trace_stop"() : () -> ()
    %cst_12 = arith.constant dense<0xFF800000> : vector<4x8xf32>
    %19 = vector.multi_reduction <maximumf>, %18, %cst_12 [2] : vector<4x8x8xf32> to vector<4x8xf32>
    %20 = vector.shape_cast %19 : vector<4x8xf32> to vector<4x8x1xf32>
    %21 = vector.broadcast %20 : vector<4x8x1xf32> to vector<4x8x8xf32>
    %22 = arith.subf %18, %21 : vector<4x8x8xf32>
    %23 = math.exp %22 : vector<4x8x8xf32>
    %cst_13 = arith.constant dense<0.000000e+00> : vector<4x8xf32>
    %24 = vector.multi_reduction <add>, %23, %cst_13 [2] : vector<4x8x8xf32> to vector<4x8xf32>
    %25 = vector.shape_cast %24 : vector<4x8xf32> to vector<4x8x1xf32>
    %26 = tpu.reciprocal %25 {approx = true} : vector<4x8x1xf32> -> vector<4x8x1xf32>
    %27 = vector.broadcast %26 : vector<4x8x1xf32> to vector<4x8x8xf32>
    %28 = arith.mulf %23, %27 : vector<4x8x8xf32>
    "tpu.trace_start"() <{level = 10 : i32, message = "hqk,hkd->hqd"}> : () -> ()
    %cst_14 = arith.constant dense<0.000000e+00> : vector<4x8x8xf32>
    %29 = tpu.matmul %28, %17, %cst_14 {dimension_numbers = #tpu.dot_dimension_numbers<[2], [1], [1], [2], [0, 0, 0, 1, 1, 2], [0], [0]>} : vector<4x8x8xf32>, vector<4x8x8xf32>, vector<4x8x8xf32> -> vector<4x8x8xf32>
    "tpu.trace_stop"() : () -> ()
    %30 = tpu.transpose %29, [1, 0, 2] : vector<4x8x8xf32> -> vector<8x4x8xf32>
    %31 = vector.shape_cast %30 : vector<8x4x8xf32> to vector<8x32xf32>
    %c0_15 = arith.constant 0 : index
    %c0_16 = arith.constant 0 : index
    %32 = vector.load %arg6[%c0_15, %c0_16] : memref<32x32xf32, #tpu.memory_space<vmem>>, vector<32x32xf32>
    %cst_17 = arith.constant dense<0.000000e+00> : vector<8x32xf32>
    %33 = tpu.matmul %31, %32, %cst_17 {dimension_numbers = #tpu.dot_dimension_numbers<[1], [1], [0], [0], [0, 0, 1, 0], [], []>} : vector<8x32xf32>, vector<32x32xf32>, vector<8x32xf32> -> vector<8x32xf32>
    %c0_18 = arith.constant 0 : index
    %c0_19 = arith.constant 0 : index
    %34 = vector.load %arg7[%c0_18, %c0_19] : memref<1x32xf32, #tpu.memory_space<vmem>>, vector<1x32xf32>
    %35 = vector.broadcast %34 : vector<1x32xf32> to vector<8x32xf32>
    %36 = arith.addf %33, %35 : vector<8x32xf32>
    %c0_20 = arith.constant 0 : index
    %c0_21 = arith.constant 0 : index
    %c0_22 = arith.constant 0 : index
    %37 = vector.load %arg8[%c0_20, %c0_21, %c0_22] : memref<1x8x32xf32, #tpu.memory_space<vmem>>, vector<1x8x32xf32>
    %38 = vector.shape_cast %37 : vector<1x8x32xf32> to vector<8x32xf32>
    %39 = vector.shape_cast %36 : vector<8x32xf32> to vector<1x8x32xf32>
    tpu.vector_store %arg8[%c0_20, %c0_21, %c0_22], %39 {strides = array<i32>} : memref<1x8x32xf32, #tpu.memory_space<vmem>>, vector<1x8x32xf32>,
    return
  }
  func.func @transform_0(%arg0: i32, %arg1: i32) -> (i32, i32, i32) {
    %c0_i32 = arith.constant 0 : i32
    %c0_i32_0 = arith.constant 0 : i32
    return %arg0, %arg1, %c0_i32 : i32, i32, i32
  }
  func.func @transform_1(%arg0: i32, %arg1: i32) -> (i32, i32, i32) {
    %c0_i32 = arith.constant 0 : i32
    %c0_i32_0 = arith.constant 0 : i32
    %c0_i32_1 = arith.constant 0 : i32
    return %arg0, %c0_i32, %c0_i32_0 : i32, i32, i32
  }
  func.func @transform_2(%arg0: i32, %arg1: i32) -> (i32, i32) {
    %c0_i32 = arith.constant 0 : i32
    %c0_i32_0 = arith.constant 0 : i32
    %c0_i32_1 = arith.constant 0 : i32
    return %c0_i32, %c0_i32_0 : i32, i32
  }
  func.func @transform_3(%arg0: i32, %arg1: i32) -> (i32, i32) {
    %c0_i32 = arith.constant 0 : i32
    %c0_i32_0 = arith.constant 0 : i32
    %c0_i32_1 = arith.constant 0 : i32
    return %c0_i32, %c0_i32_0 : i32, i32
  }
  func.func @transform_4(%arg0: i32, %arg1: i32) -> (i32, i32) {
    %c0_i32 = arith.constant 0 : i32
    %c0_i32_0 = arith.constant 0 : i32
    %c0_i32_1 = arith.constant 0 : i32
    return %c0_i32, %c0_i32_0 : i32, i32
  }
  func.func @transform_5(%arg0: i32, %arg1: i32) -> (i32, i32) {
    %c0_i32 = arith.constant 0 : i32
    %c0_i32_0 = arith.constant 0 : i32
    %c0_i32_1 = arith.constant 0 : i32
    return %c0_i32, %c0_i32_0 : i32, i32
  }
  func.func @transform_6(%arg0: i32, %arg1: i32) -> (i32, i32, i32) {
    %c0_i32 = arith.constant 0 : i32
    %c0_i32_0 = arith.constant 0 : i32
    return %arg0, %arg1, %c0_i32 : i32, i32, i32
  }
}

</mosaic_0001>

<bundles_post_ra>
// kernel: tpu_custom_call.1
= control target key start
LH: loop header
LB: loop body
LE: loop exit
PB: predicated region body
PF: predicated region fallthrough
CT: control target
= control target key end

     0   :  { %11 = vsyncpa [#allocation3], 0  ;;  %s1915_s0 = inlined_call_operand.vmem [shape: f32[2,8,32], index: 0, kind: input, shape index: {}]   ;;  %s1916_s1 = inlined_call_operand.vmem [shape: f32[2,8,32], index: 1, kind: input, shape index: {}]   ;;  %s1917_s2 = inlined_call_operand.vmem [shape: f32[32,32], index: 2, kind: input, shape index: {}]   ;;  %s1918_s3 = inlined_call_operand.vmem [shape: f32[64,32], index: 3, kind: input, shape index: {}]   ;;  %s1919_s4 = inlined_call_operand.vmem [shape: f32[32,32], index: 4, kind: input, shape index: {}]   ;;  %s1920_s5 = inlined_call_operand.vmem [shape: f32[1,32], index: 5, kind: input, shape index: {}]   ;;  %s1921_s6 = inlined_call_operand.hbm [shape: f32[2,8,32], index: 6, kind: output, shape index: {}]  }
   0x1   :  { %13 = vsyncpa [#allocation3 + $0x1], 0  ;;  %s1520_s21 = smov 0   ;;  %s1522_s22 = smov 0  }
   0x2   :  { %s1524_s23 = smov 0   ;;  %s1526_s24 = smov 0  }
   0x3   :  { %s1528_s25 = smov 0   ;;  %s1530_s26 = smov 0  }
   0x4 LB: > { %s1262_s27 = sadd.s32 4294967295, %s1474_s26   ;;  %s1263_s28 = sadd.s32 4294967294, %s1474_s26   ;;  %s1474_s26 = sphi %s1530_s26, %s19_s26   ;;  %s1470_s25 = sphi %s1528_s25, %s1928_s25   ;;  %s1466_s24 = sphi %s1526_s24, %s1927_s24   ;;  %s1462_s23 = sphi %s1524_s23, %s1926_s23   ;;  %s1458_s22 = sphi %s1522_s22, %s1925_s22   ;;  %s1454_s21 = sphi %s1520_s21, %s1924_s21  }
   0x5   : > { %s31_s29 = sadd.s32 1, %s1470_s25  ;;  %s178_s30 = sadd.s32 1, %s1462_s23 }
   0x6   : > { %p33_p0 = scmp.ge.s32.totalorder %s31_s29, 2  ;;  %p188_p1 = scmp.ne.s32.totalorder %s1462_s23, %s1458_s22 }
   0x7   : > { %p189_p2 = scmp.eq.s32.totalorder %s1262_s27, 1  ;;  %p194_p3 = scmp.ne.s32.totalorder %s1458_s22, %s1454_s21 }
   0x8   : > { %s1930_s29 = smov (%p33_p0, %s31_s29), 0  ;;  %p195_p5 = scmp.eq.s32.totalorder %s1263_s28, 1 }
   0x9   : > { %p1560_p4 = por %p189_p2, %p188_p1  ;;  %s173_s8 = ssub.s32 %s1470_s25, %s1930_s29 }
   0xa   : > { %p1266_p6 = scmp.ge.s32.totalorder %s1474_s26, 1  ;;  %p176_p7 = scmp.eq.s32.totalorder %s173_s8, 0 }
   0xb   : > { %p1567_p8 = por %p195_p5, %p194_p3  ;;  %p242_p9 = scmp.lt.s32.totalorder %s1474_s26, 3 }
   0xc   : > { %s1573_s10 = scalar_select %p176_p7, %s1462_s23, %s178_s30  }
   0xd   : > { %p243_p10 = pnand %p1266_p6, %p242_p9 }
   0xe   : > { %p278_p11 = scmp.lt.s32.totalorder (!%p243_p10), %s1466_s24, 1  ;;  %s1476_s16 = smov (!%p243_p10), 112  }
   0xf   : > { %246 = sbr.rel (%p243_p10) target bundleno = 1147 (0x47b), region = 44  ;;  %s1478_s18 = smov (!%p243_p10), 120  }
  0x10   : > { %s1483_s20 = smov (!%p243_p10), 8   ;;  %s1484_s27 = smov (!%p243_p10), 24  }
  0x14   : > { %v294_v0 = vld [vmem:[%s1917_s2 + $0x18] sm:$0xff]  ;;  %vm295_vm0 = vcmask 261120   ;;  %v293_v2 = vld [vmem:[%s1917_s2 + $0x10] sm:$0xff]  ;;  %s279_s19 = scalar_select %p278_p11, %s1466_s24, 1  ;;  %v292_v4 = vld [vmem:[%s1917_s2 + $0x8] sm:$0xff]  ;;  %vm398_vm1 = vcmask 1047556  }
  0x15   : > { %v339_v1 = vld [vmem:[%s1918_s3 + $0x38] sm:$0xff]  ;;  %1270 = vmatpush.xpose.msk.msra.mxu0 %vm295_vm0, %v294_v0  ;;  %v338_v3 = vld [vmem:[%s1918_s3 + $0x30] sm:$0xff]  ;;  %v337_v5 = vld [vmem:[%s1918_s3 + $0x28] sm:$0xff]  ;;  %v1479_v18 = vmov 1983009808   ;;  %vm750_vm2 = vcmask 64512  }
  0x16   : > { %1275 = vmatpush.xpose.msk.msra.mxu1 %vm295_vm0, %v339_v1  ;;  %s1268_s8 = sshll.u32 %s279_s19, 3  ;;  %v291_v6 = vld [vmem:[%s1917_s2] sm:$0xff]  ;;  %v335_v9 = vld [vmem:[%s1918_s3 + $0x18] sm:$0xff]  ;;  %v334_v10 = vld [vmem:[%s1918_s3 + $0x10] sm:$0xff]  ;;  %v403_v19 = vunpack.c.l.s4 %v1479_v18  ;;  %v1480_v32 = vmov 1934713408  }
  0x17   : > { %v336_v7 = vld [vmem:[%s1918_s3 + $0x20] sm:$0xff]  ;;  %s284_s17 = scalar_lea.vmem %s1915_s0, %s1268_s8  ;;  %v333_v11 = vld [vmem:[%s1918_s3 + $0x8] sm:$0xff]  ;;  %s288_s15 = scalar_lea.vmem %s1916_s1, %s1268_s8  ;;  %v427_v33 = vunpack.c.l.s4 %v1480_v32  ;;  %vm1114_vm3 = vcmask 130048   ;;  %vm1116_vm4 = vcmask 195584  }
  0x18   : > { %v289_v8 = vld [vmem:[%s284_s17] sm:$0xff]  ;;  %s1477_s17 = smov 104   ;;  %v1644_v26 = vunpack.c.0.s8 %v403_v19  ;;  %s1481_s8 = smov 96  }
  0x19   : > { %1271 = vmatpush.xpose.msk.msra.mxu0 %vm295_vm0, %v293_v2  ;;  %v332_v12 = vld [vmem:[%s1918_s3] sm:$0xff]  ;;  %v1659_v42 = vunpack.c.0.s8 %v427_v33  ;;  %s1482_s19 = smov 16  }
  0x1a   : > { %1276 = vmatpush.xpose.msk.msra.mxu1 %vm295_vm0, %v338_v3  ;;  %v290_v13 = vld [vmem:[%s288_s15] sm:$0xff] }
  0x1d   : > { %1272 = vmatpush.xpose.msk.msra.mxu0 %vm295_vm0, %v292_v4 }
  0x1e   : > { %1277 = vmatpush.xpose.msk.msra.mxu1 %vm295_vm0, %v337_v5 }
  0x21   : > { %1273 = vmatpush.xpose.msk.msra.mxu0 %vm295_vm0, %v291_v6 }
  0x22   : > { %1278 = vmatpush.xpose.msk.msra.mxu1 %vm295_vm0, %v336_v7 }
  0x24   : > { %1274 = vmatmul.msk.f32.vlgmr.msra.gmra.mxu0 %vm295_vm0, %v289_v8 }
  0x26   : > { %1279 = vmatpush.xpose.msk.msra.mxu1 %vm295_vm0, %v335_v9 }
  0x2a   : > { %1280 = vmatpush.xpose.msk.msra.mxu1 %vm295_vm0, %v334_v10 }
  0x2e   : > { %1281 = vmatpush.xpose.msk.msra.mxu1 %vm295_vm0, %v333_v11 }
  0x32   : > { %1282 = vmatpush.xpose.msk.msra.mxu1 %vm295_vm0, %v332_v12 }
  0x35   : > { %1283 = vmatmul.msk.f32.vlgmr.msra.gmra.mxu1 %vm295_vm0, %v290_v13 }
  0xa1   : > { %v328_v14 = vpop.f32.mrf.mxu0 }
  0xa2   : > { %v331_v15 = vmul.f32 0.35355338, %v328_v14 }
  0xa4   : > { %391 = vrot.lane.b32.xlu2 %v331_v15, %s1476_s16  ;;  %v400_v25 = vrot.slane %v331_v15, 4 }
  0xac   : > { %394 = vrot.lane.b32.xlu2 %v331_v15, %s1477_s17 }
  0xb2   : > { %v1633_v16 = vpop.f32.mrf.mxu1 }
  0xb3   : > { %515 = vrot.lane.b32.xlu1 %v1633_v16, %s1477_s17  ;;  %509 = vrot.lane.b32.xlu0 %v1633_v16, %s1478_s18  ;;  %v520_v35 = vrot.slane %v1633_v16, 4  ;;  %s275_s17 = sand.u32 1, %s1458_s22  }
  0xb4   : > { %s1163_s14 = scalar_lea.sflag [#allocation3], %s275_s17 }
  0xbb   : > { %512 = vrot.lane.b32.xlu0 %v1633_v16, %s1476_s16  ;;  %388 = vrot.lane.b32.xlu1 %v331_v15, %s1478_s18  ;;  %s1267_s18 = sshll.u32 %s275_s17, 3 }
  0xbc   : > { %s277_s11 = scalar_lea.vmem [#allocation2], %s1267_s18  ;;  %s1416_s18 = scalar_lea.hbm %s1921_s6, 16 }
  0xbd   : > { %s1176_s12 = sshll.u32 %s277_s11, 4  ;;  %s1177_s12 = int_to_ptr.vmem [resolvable:$true] %s1176_s12 }
  0xfe   : > { %v392_v17 = vpop.permute.xlu2 %391 }
  0xff   : > { %v397_v20 = vrot.slane %v392_v17, 4  ;;  %v401_v29 = vsel %vm398_vm1, %v392_v17, %v400_v25 }
 0x100   : > { %v409_v37 = vperm.slane %v401_v29, %v1644_v26 }
 0x101   : > { %v399_v28 = vsel %vm398_vm1, %v397_v20, %v331_v15 }
 0x102   : > { %v405_v36 = vperm.slane %v399_v28, %v1644_v26  ;;  %v436_v51 = vrot.slane %v409_v37, 4 }
 0x104   : > { %v424_v50 = vrot.slane %v405_v36, 4 }
 0x106   : > { %v395_v30 = vpop.permute.xlu2 %394 }
 0x107   : > { %v410_v38 = vrot.slane %v395_v30, 4 }
 0x125   : > { %v1638_v21 = vpop.permute.xlu1 %515  ;;  %v1640_v22 = vpop.permute.xlu0 %509 }
 0x126   : > { %v530_v23 = vrot.slane %v1638_v21, 4  ;;  %v532_v24 = vrot.slane %v1640_v22, 4 }
 0x128   : > { %v533_v27 = vsel %vm398_vm1, %v1638_v21, %v532_v24  ;;  %v531_v31 = vsel %vm398_vm1, %v530_v23, %v1640_v22 }
 0x129   : > { %v541_v34 = vperm.slane %v533_v27, %v1644_v26  ;;  %v537_v39 = vperm.slane %v531_v31, %v1644_v26 }
 0x12b   : > { %v554_v46 = vrot.slane %v541_v34, 4  ;;  %v542_v52 = vrot.slane %v537_v39, 4 }
 0x12d   : > { %v1657_v40 = vpop.permute.xlu0 %512  ;;  %v389_v41 = vpop.permute.xlu1 %388 }
 0x12e   : > { %v518_v43 = vrot.slane %v1657_v40, 4  ;;  %v521_v44 = vsel %vm398_vm1, %v1657_v40, %v520_v35  ;;  %v411_v45 = vsel %vm398_vm1, %v410_v38, %v389_v41  ;;  %v412_v48 = vrot.slane %v389_v41, 4 }
 0x12f   : > { %v529_v47 = vperm.slane %v521_v44, %v1644_v26  ;;  %v417_v49 = vperm.slane %v411_v45, %v1644_v26 }
 0x130   : > { %v519_v53 = vsel %vm398_vm1, %v518_v43, %v1633_v16  ;;  %v413_v57 = vsel %vm398_vm1, %v395_v30, %v412_v48 }
 0x131   : > { %v525_v54 = vperm.slane %v519_v53, %v1644_v26  ;;  %v555_v55 = vsel %vm398_vm1, %v554_v46, %v529_v47  ;;  %v556_v56 = vrot.slane %v529_v47, 4  ;;  %v421_v59 = vperm.slane %v413_v57, %v1644_v26 }
 0x132   : > { %v561_v58 = vperm.slane %v555_v55, %v1659_v42  ;;  %v422_v60 = vrot.slane %v417_v49, 4  ;;  %v425_v61 = vsel %vm398_vm1, %v417_v49, %v424_v50 }
 0x133   : > { %v543_v62 = vsel %vm398_vm1, %v542_v52, %v525_v54  ;;  %v544_v63 = vrot.slane %v525_v54, 4  ;;  %v557_v0 = vsel %vm398_vm1, %v541_v34, %v556_v56  ;;  %v433_v1 = vperm.slane %v425_v61, %v1659_v42 }
 0x134   : > { %v549_v2 = vperm.slane %v543_v62, %v1659_v42  ;;  %v565_v3 = vperm.slane %v557_v0, %v1659_v42  ;;  %v570_v4 = vrot.slane %v561_v58, 4  ;;  %v423_v5 = vsel %vm398_vm1, %v422_v60, %v405_v36 }
 0x135   : > { %v545_v6 = vsel %vm398_vm1, %v537_v39, %v544_v63  ;;  %v429_v7 = vperm.slane %v423_v5, %v1659_v42  ;;  %v434_v8 = vrot.slane %v421_v59, 4  ;;  %v437_v9 = vsel %vm398_vm1, %v421_v59, %v436_v51 }
 0x136   : > { %v566_v10 = vrot.slane %v549_v2, 4  ;;  %v571_v11 = vsel %vm398_vm1, 0.0, %v570_v4  ;;  %v572_v12 = vrot.slane %v565_v3, 4  ;;  %v445_v13 = vperm.slane %v437_v9, %v1659_v42 }
 0x137   : > { %v435_v14 = vsel %vm398_vm1, %v434_v8, %v409_v37  ;;  %v446_v15 = vrot.slane %v429_v7, 4  ;;  %v448_v17 = vrot.slane %v433_v1, 4  ;;  %v553_v18 = vperm.slane %v545_v6, %v1659_v42 }
 0x138   : > { %v573_v19 = vsel %vm398_vm1, 0.0, %v572_v12  ;;  %v441_v20 = vperm.slane %v435_v14, %v1659_v42  ;;  %v452_v23 = vrot.slane %v445_v13, 4  ;;  %v567_v24 = vsel %vm398_vm1, 0.0, %v566_v10 }
 0x139   : > { %v590_v25 = vrot.slane %v573_v19, 4  ;;  %v447_v27 = vsel %vm398_vm1, 0.0, %v446_v15  ;;  %v449_v28 = vsel %vm398_vm1, 0.0, %v448_v17  ;;  %v568_v29 = vrot.slane %v553_v18, 4 }
 0x13a   : > { %v450_v30 = vrot.slane %v441_v20, 4  ;;  %v453_v31 = vsel %vm398_vm1, 0.0, %v452_v23  ;;  %v459_v32 = vrot.slane %v449_v28, 4  ;;  %v585_v33 = vsel %vm398_vm1, %v572_v12, %v561_v58 }
 0x13b   : > { %v470_v34 = vrot.slane %v453_v31, 4  ;;  %v569_v35 = vsel %vm398_vm1, 0.0, %v568_v29  ;;  %v574_v36 = vsel %vm398_vm1, %v568_v29, %v549_v2  ;;  %v589_v37 = vperm.slane %v585_v33, %v1644_v26 }
 0x13c   : > { %v451_v38 = vsel %vm398_vm1, 0.0, %v450_v30  ;;  %v578_v39 = vperm.slane %v574_v36, %v1644_v26  ;;  %v579_v41 = vrot.slane %v569_v35, 4  ;;  %v591_v43 = vsel %vm398_vm1, %v590_v25, %v571_v11 }
 0x13d   : > { %v595_v44 = vperm.slane %v591_v43, %v1644_v26  ;;  %v610_v45 = vrot.slane %v589_v37, 4  ;;  %v454_v46 = vsel %vm398_vm1, %v448_v17, %v429_v7  ;;  %v460_v47 = vsel %vm398_vm1, %v459_v32, %v447_v27 }
 0x13e   : > { %v580_v48 = vsel %vm398_vm1, %v579_v41, %v567_v24  ;;  %v598_v49 = vrot.slane %v578_v39, 4  ;;  %v458_v50 = vperm.slane %v454_v46, %v1644_v26  ;;  %v464_v51 = vperm.slane %v460_v47, %v1644_v26 }
 0x13f   : > { %v584_v52 = vperm.slane %v580_v48, %v1644_v26  ;;  %v608_v53 = vrot.slane %v595_v44, 4  ;;  %v611_v54 = vsel %vm398_vm1, %v595_v44, %v610_v45  ;;  %v465_v55 = vsel %vm398_vm1, %v452_v23, %v441_v20 }
 0x140   : > { %v619_v56 = vperm.slane %v611_v54, %v1659_v42  ;;  %v469_v57 = vperm.slane %v465_v55, %v1644_v26  ;;  %v471_v58 = vsel %vm398_vm1, %v470_v34, %v451_v38  ;;  %v476_v59 = vrot.slane %v464_v51, 4 }
 0x141   : > { %v596_v60 = vrot.slane %v584_v52, 4  ;;  %v609_v61 = vsel %vm398_vm1, %v608_v53, %v589_v37  ;;  %v599_v62 = vsel %vm398_vm1, %v584_v52, %v598_v49  ;;  %v475_v63 = vperm.slane %v471_v58, %v1644_v26 }
 0x142   : > { %v615_v0 = vperm.slane %v609_v61, %v1659_v42  ;;  %v607_v1 = vperm.slane %v599_v62, %v1659_v42  ;;  %v624_v2 = vrot.slane %v619_v56, 4  ;;  %v477_v3 = vsel %vm398_vm1, %v476_v59, %v458_v50 }
 0x143   : > { %v597_v4 = vsel %vm398_vm1, %v596_v60, %v578_v39  ;;  %v483_v5 = vperm.slane %v477_v3, %v1659_v42  ;;  %v488_v6 = vrot.slane %v475_v63, 4  ;;  %v478_v7 = vrot.slane %v458_v50, 4 }
 0x144   : > { %v603_v8 = vperm.slane %v597_v4, %v1659_v42  ;;  %v620_v9 = vrot.slane %v615_v0, 4  ;;  %v626_v10 = vrot.slane %v607_v1, 4  ;;  %v490_v13 = vrot.slane %v469_v57, 4 }
 0x145   : > { %v489_v11 = vsel %vm398_vm1, %v488_v6, %v469_v57  ;;  %v479_v12 = vsel %vm398_vm1, %v464_v51, %v478_v7  ;;  %v625_v19 = vsel %vm398_vm1, %v624_v2, %v607_v1  ;;  %v502_v24 = vrot.slane %v483_v5, 4 }
 0x146   : > { %v621_v14 = vsel %vm398_vm1, %v620_v9, %v603_v8  ;;  %v627_v15 = vsel %vm398_vm1, %v619_v56, %v626_v10  ;;  %v622_v17 = vrot.slane %v603_v8, 4  ;;  %v495_v18 = vperm.slane %v489_v11, %v1659_v42 }
 0x147   : > { %1284 = vmatpush.xpose.msk.msra.mxu2 %vm750_vm2, %v621_v14  ;;  %1290 = vmatpush.xpose.msk.msra.mxu3 %vm750_vm2, %v627_v15  ;;  %v487_v20 = vperm.slane %v479_v12, %v1659_v42  ;;  %v491_v23 = vsel %vm398_vm1, %v475_v63, %v490_v13  ;;  %v1369_v45 = vpack.i.bf16 %v1640_v22, %v1633_v16 }
 0x148   : > { %v623_v25 = vsel %vm398_vm1, %v615_v0, %v622_v17  ;;  %v500_v27 = vrot.slane %v495_v18, 4  ;;  %v499_v28 = vperm.slane %v491_v23, %v1659_v42  ;;  %v503_v32 = vsel %vm398_vm1, %v495_v18, %v502_v24 }
 0x149   : > { %1286 = vmatpush.xpose.msk.msrb.mxu0 %vm750_vm2, %v623_v25  ;;  %v506_v29 = vrot.slane %v487_v20, 4  ;;  %v1374_v46 = vpack.i.bf16 %v1638_v21, %v1657_v40 }
 0x14a   : > { %v501_v30 = vsel %vm398_vm1, %v500_v27, %v483_v5  ;;  %v504_v33 = vrot.slane %v499_v28, 4 }
 0x14b   : > { %1288 = vmatpush.xpose.msk.msrb.mxu2 %vm750_vm2, %v625_v19  ;;  %v507_v31 = vsel %vm398_vm1, %v499_v28, %v506_v29 }
 0x14c   : > { %1285 = vmatmul.msk.f32.vlgmr.msra.gmra.mxu2 %vm750_vm2, %v501_v30  ;;  %1291 = vmatmul.msk.f32.vlgmr.msra.gmra.mxu3 %vm750_vm2, %v507_v31  ;;  %v505_v34 = vsel %vm398_vm1, %v504_v33, %v487_v20 }
 0x14d   : > { %1287 = vmatmul.msk.f32.vlgmr.msrb.gmra.mxu0 %vm750_vm2, %v503_v32 }
 0x154   : > { %1289 = vmatmul.msk.f32.vlgmr.msrb.gmra.mxu2 %vm750_vm2, %v505_v34 }
 0x1ca   : > { %v800_v35 = vpop.f32.mrf.mxu0 }
 0x1cb   : > { %v858_v36 = vsel %vm750_vm2, %v800_v35, -inf }
 0x1cc   : > { %859 = vmax.xlane.f32.xlu2 %v858_v36 }
 0x1cf   : > { %v774_v37 = vpop.f32.mrf.mxu2  ;;  %v852_v38 = vpop.f32.mrf.mxu3 }
 0x1d0   : > { %v855_v39 = vsel %vm750_vm2, %v774_v37, -inf  ;;  %v864_v41 = vsel %vm750_vm2, %v852_v38, -inf }
 0x1d1   : > { %856 = vmax.xlane.f32.xlu0 %v855_v39  ;;  %865 = vmax.xlane.f32.xlu1 %v864_v41 }
 0x1d7   : > { %v826_v43 = vpop.f32.mrf.mxu2 }
 0x1d8   : > { %v861_v44 = vsel %vm750_vm2, %v826_v43, -inf }
 0x1d9   : > { %862 = vmax.xlane.f32.xlu2 %v861_v44 }
 0x1e5   : > { %1370 = vrot.lane.b32.xlu0 %v1369_v45, %s1481_s8 }
 0x1ea   : > { %1375 = vrot.lane.b32.xlu1 %v1374_v46, %s1481_s8  ;;  %s1302_s8 = sshll.u32 %s1466_s24, 3 }
 0x23f   : > { %v860_v47 = vpop.xlane.xlu2 %859 }
 0x240   : > { %v868_v48 = vsub.f32 %v800_v35, %v860_v47 }
 0x242   : > { %v873_v49 = vmul.f32 1.442695, %v868_v48 }
 0x244   : > { %1380 = vpow2.f32 %v873_v49  ;;  %v857_v50 = vpop.xlane.xlu0 %856  ;;  %v866_v51 = vpop.xlane.xlu1 %865 }
 0x245   : > { %v867_v52 = vsub.f32 %v774_v37, %v857_v50  ;;  %v870_v53 = vsub.f32 %v852_v38, %v866_v51 }
 0x247   : > { %v871_v54 = vmul.f32 1.442695, %v867_v52  ;;  %v877_v56 = vmul.f32 1.442695, %v870_v53 }
 0x249   : > { %1382 = vpow2.f32 %v871_v54 }
 0x24a   : > { %v1752_v55 = vpop.eup %1380  ;;  %1384 = vpow2.f32 %v877_v56 }
 0x24b   : > { %v882_v16 = vsel %vm750_vm2, %v1752_v55, 0.0 }
 0x24c   : > { %v863_v22 = vpop.xlane.xlu2 %862  ;;  %883 = vadd.xlane.f32.xlu0 %v882_v16 }
 0x24d   : > { %v869_v21 = vsub.f32 %v826_v43, %v863_v22 }
 0x24f   : > { %v1756_v40 = vpop.eup %1382  ;;  %v875_v58 = vmul.f32 1.442695, %v869_v21 }
 0x250   : > { %v879_v57 = vsel %vm750_vm2, %v1756_v40, 0.0  ;;  %v1760_v59 = vpop.eup %1384 }
 0x251   : > { %880 = vadd.xlane.f32.xlu2 %v879_v57  ;;  %1386 = vpow2.f32 %v875_v58  ;;  %v888_v61 = vsel %vm750_vm2, %v1760_v59, 0.0 }
 0x257   : > { %v1371_v60 = vpop.permute.xlu0 %1370  ;;  %v1764_v0 = vpop.eup %1386 }
 0x258   : > { %v1373_v62 = vunpack.i.h.bf16 %v1371_v60  ;;  %v1372_v63 = vunpack.i.l.bf16 %v1371_v60  ;;  %v885_v6 = vsel %vm750_vm2, %v1764_v0, 0.0 }
 0x259   : > { %889 = vadd.xlane.f32.xlu2 %v888_v61 }
 0x25a   : > { %v654_v2 = vrot.slane %v1373_v62, 4  ;;  %v642_v3 = vrot.slane %v1372_v63, 4 }
 0x25c   : > { %v1376_v1 = vpop.permute.xlu1 %1375 }
 0x25d   : > { %v1378_v4 = vunpack.i.h.bf16 %v1376_v1  ;;  %v1377_v5 = vunpack.i.l.bf16 %v1376_v1 }
 0x25f   : > { %v652_v7 = vrot.slane %v1378_v4, 4  ;;  %v640_v8 = vrot.slane %v1377_v5, 4  ;;  %v643_v9 = vsel %vm398_vm1, %v1377_v5, %v642_v3  ;;  %v655_v10 = vsel %vm398_vm1, %v1378_v4, %v654_v2 }
 0x260   : > { %v651_v11 = vperm.slane %v643_v9, %v1644_v26  ;;  %v663_v12 = vperm.slane %v655_v10, %v1644_v26 }
 0x261   : > { %886 = vadd.xlane.f32.xlu2 %v885_v6  ;;  %v641_v13 = vsel %vm398_vm1, %v640_v8, %v1372_v63  ;;  %v653_v14 = vsel %vm398_vm1, %v652_v7, %v1373_v62 }
 0x262   : > { %v647_v15 = vperm.slane %v641_v13, %v1644_v26  ;;  %v659_v17 = vperm.slane %v653_v14, %v1644_v26  ;;  %v676_v18 = vrot.slane %v663_v12, 4  ;;  %v678_v19 = vrot.slane %v651_v11, 4 }
 0x264   : > { %v664_v20 = vrot.slane %v659_v17, 4  ;;  %v666_v23 = vrot.slane %v647_v15, 4  ;;  %v677_v24 = vsel %vm398_vm1, %v676_v18, %v651_v11  ;;  %v679_v25 = vsel %vm398_vm1, %v663_v12, %v678_v19 }
 0x265   : > { %v683_v27 = vperm.slane %v677_v24, %v1659_v42  ;;  %v687_v28 = vperm.slane %v679_v25, %v1659_v42 }
 0x266   : > { %v665_v29 = vsel %vm398_vm1, %v664_v20, %v647_v15  ;;  %v667_v30 = vsel %vm398_vm1, %v659_v17, %v666_v23 }
 0x267   : > { %v671_v31 = vperm.slane %v665_v29, %v1659_v42  ;;  %v675_v32 = vperm.slane %v667_v30, %v1659_v42  ;;  %v692_v33 = vrot.slane %v683_v27, 4  ;;  %v694_v34 = vrot.slane %v687_v28, 4 }
 0x269   : > { %v688_v35 = vrot.slane %v671_v31, 4  ;;  %v690_v36 = vrot.slane %v675_v32, 4  ;;  %v695_v37 = vsel %vm398_vm1, 0.0, %v694_v34  ;;  %v707_v38 = vsel %vm398_vm1, %v694_v34, %v683_v27 }
 0x26a   : > { %v712_v39 = vrot.slane %v695_v37, 4  ;;  %v693_v43 = vsel %vm398_vm1, 0.0, %v692_v33  ;;  %v711_v45 = vperm.slane %v707_v38, %v1644_v26 }
 0x26b   : > { %v691_v41 = vsel %vm398_vm1, 0.0, %v690_v36  ;;  %v696_v44 = vsel %vm398_vm1, %v690_v36, %v671_v31  ;;  %v689_v49 = vsel %vm398_vm1, 0.0, %v688_v35 }
 0x26c   : > { %v701_v46 = vrot.slane %v691_v41, 4  ;;  %v700_v47 = vperm.slane %v696_v44, %v1644_v26  ;;  %v713_v48 = vsel %vm398_vm1, %v712_v39, %v693_v43  ;;  %v732_v51 = vrot.slane %v711_v45, 4 }
 0x26d   : > { %v717_v50 = vperm.slane %v713_v48, %v1644_v26 }
 0x26e   : > { %v702_v52 = vsel %vm398_vm1, %v701_v46, %v689_v49  ;;  %v720_v53 = vrot.slane %v700_v47, 4 }
 0x26f   : > { %v706_v54 = vperm.slane %v702_v52, %v1644_v26  ;;  %v733_v56 = vsel %vm398_vm1, %v717_v50, %v732_v51  ;;  %v730_v16 = vrot.slane %v717_v50, 4 }
 0x270   : > { %v741_v22 = vperm.slane %v733_v56, %v1659_v42 }
 0x271   : > { %v721_v21 = vsel %vm398_vm1, %v706_v54, %v720_v53  ;;  %v718_v57 = vrot.slane %v706_v54, 4  ;;  %v731_v58 = vsel %vm398_vm1, %v730_v16, %v711_v45 }
 0x272   : > { %v729_v60 = vperm.slane %v721_v21, %v1659_v42  ;;  %v746_v61 = vrot.slane %v741_v22, 4  ;;  %v737_v62 = vperm.slane %v731_v58, %v1659_v42 }
 0x273   : > { %v719_v63 = vsel %vm398_vm1, %v718_v57, %v700_v47 }
 0x274   : > { %v747_v1 = vsel %vm398_vm1, %v746_v61, %v729_v60  ;;  %v725_v2 = vperm.slane %v719_v63, %v1659_v42  ;;  %v742_v3 = vrot.slane %v737_v62, 4  ;;  %v748_v4 = vrot.slane %v729_v60, 4 }
 0x275   : > { %963 = vmatpush.msra.mxu0 %v747_v1 }
 0x276   : > { %v743_v5 = vsel %vm398_vm1, %v742_v3, %v725_v2  ;;  %v749_v6 = vsel %vm398_vm1, %v741_v22, %v748_v4  ;;  %v744_v7 = vrot.slane %v725_v2, 4 }
 0x277   : > { %917 = vmatpush.msra.mxu2 %v743_v5 }
 0x278   : > { %v745_v8 = vsel %vm398_vm1, %v737_v62, %v744_v7 }
 0x279   : > { %986 = vmatpush.msrb.mxu2 %v749_v6  ;;  %940 = vmatpush.msrb.mxu3 %v745_v8 }
 0x2bf   : > { %v884_v9 = vpop.xlane.xlu0 %883 }
 0x2c0   : > { %1388 = vrcp.f32 %v884_v9 }
 0x2c4   : > { %v881_v10 = vpop.xlane.xlu2 %880 }
 0x2c5   : > { %1390 = vrcp.f32 %v881_v10 }
 0x2c6   : > { %v1389_v11 = vpop.eup %1388 }
 0x2c7   : > { %v896_v12 = vmul.f32 %v1389_v11, %v1752_v55 }
 0x2c9   : > { %1293 = vmatmul.msk.f32.vlgmr.msrb.gmra.mxu3 %vm750_vm2, %v896_v12 }
 0x2cb   : > { %v1391_v13 = vpop.eup %1390 }
 0x2cc   : > { %v895_v14 = vmul.f32 %v1391_v13, %v1756_v40  ;;  %v890_v15 = vpop.xlane.xlu2 %889 }
 0x2cd   : > { %1392 = vrcp.f32 %v890_v15 }
 0x2ce   : > { %1292 = vmatmul.msk.f32.vlgmr.msra.gmra.mxu2 %vm750_vm2, %v895_v14 }
 0x2d3   : > { %v1393_v17 = vpop.eup %1392 }
 0x2d4   : > { %v898_v18 = vmul.f32 %v1393_v17, %v1760_v59  ;;  %v887_v19 = vpop.xlane.xlu2 %886 }
 0x2d5   : > { %1394 = vrcp.f32 %v887_v19 }
 0x2d6   : > { %1295 = vmatmul.msk.f32.vlgmr.msrb.gmra.mxu2 %vm750_vm2, %v898_v18 }
 0x2db   : > { %v1395_v20 = vpop.eup %1394 }
 0x2dc   : > { %v897_v23 = vmul.f32 %v1395_v20, %v1764_v0 }
 0x2de   : > { %1294 = vmatmul.msk.f32.vlgmr.msra.gmra.mxu0 %vm750_vm2, %v897_v23 }
 0x34c   : > { %v942_v24 = vpop.f32.mrf.mxu3 }
 0x34d   : > { %v1005_v25 = vrot.slane %v942_v24, 4 }
 0x351   : > { %v919_v55 = vpop.f32.mrf.mxu2 }
 0x352   : > { %v993_v27 = vrot.slane %v919_v55, 4 }
 0x359   : > { %v988_v40 = vpop.f32.mrf.mxu2 }
 0x35a   : > { %v1003_v28 = vrot.slane %v988_v40, 4  ;;  %v1006_v29 = vsel %vm398_vm1, %v988_v40, %v1005_v25  ;;  %v1121_v40 = vld [vmem:[%s1919_s4 + $0x18] sm:$0xff] }
 0x35b   : > { %v1014_v30 = vperm.slane %v1006_v29, %v1644_v26  ;;  %v965_v59 = vpop.f32.mrf.mxu0  ;;  %1296 = vmatpush.xpose.msk.msra.mxu3 %vm295_vm0, %v1121_v40 }
 0x35c   : > { %v1004_v31 = vsel %vm398_vm1, %v1003_v28, %v942_v24  ;;  %v991_v32 = vrot.slane %v965_v59, 4  ;;  %v994_v33 = vsel %vm398_vm1, %v965_v59, %v993_v27  ;;  %v1119_v27 = vld [vmem:[%s1919_s4 + $0x8] sm:$0xff]  ;;  %v1118_v28 = vld [vmem:[%s1919_s4] sm:$0xff] }
 0x35d   : > { %v1010_v0 = vperm.slane %v1004_v31, %v1644_v26  ;;  %v1027_v34 = vrot.slane %v1014_v30, 4  ;;  %v1002_v35 = vperm.slane %v994_v33, %v1644_v26 }
 0x35e   : > { %v992_v36 = vsel %vm398_vm1, %v991_v32, %v919_v55 }
 0x35f   : > { %v1015_v37 = vrot.slane %v1010_v0, 4  ;;  %v998_v38 = vperm.slane %v992_v36, %v1644_v26  ;;  %v1028_v39 = vsel %vm398_vm1, %v1027_v34, %v1002_v35  ;;  %v1029_v41 = vrot.slane %v1002_v35, 4 }
 0x360   : > { %v1034_v43 = vperm.slane %v1028_v39, %v1659_v42 }
 0x361   : > { %v1016_v44 = vsel %vm398_vm1, %v1015_v37, %v998_v38  ;;  %v1017_v45 = vrot.slane %v998_v38, 4  ;;  %v1030_v46 = vsel %vm398_vm1, %v1014_v30, %v1029_v41 }
 0x362   : > { %v1022_v47 = vperm.slane %v1016_v44, %v1659_v42  ;;  %v1038_v48 = vperm.slane %v1030_v46, %v1659_v42  ;;  %v1043_v51 = vrot.slane %v1034_v43, 4 }
 0x363   : > { %v1018_v49 = vsel %vm398_vm1, %v1010_v0, %v1017_v45  ;;  %v1379_v0 = vld [vmem:[%s1920_s5] ss:$0 sm:$0xff] }
 0x364   : > { %v1026_v50 = vperm.slane %v1018_v49, %v1659_v42  ;;  %v1045_v52 = vrot.slane %v1038_v48, 4  ;;  %v1039_v53 = vrot.slane %v1022_v47, 4  ;;  %v1044_v58 = vsel %vm398_vm1, 0.0, %v1043_v51 }
 0x366   : > { %v1041_v54 = vrot.slane %v1026_v50, 4  ;;  %v1046_v56 = vsel %vm398_vm1, 0.0, %v1045_v52  ;;  %v1058_v16 = vsel %vm398_vm1, %v1045_v52, %v1034_v43  ;;  %v1040_v2 = vsel %vm398_vm1, 0.0, %v1039_v53 }
 0x367   : > { %v1062_v22 = vperm.slane %v1058_v16, %v1644_v26  ;;  %v1063_v21 = vrot.slane %v1046_v56, 4 }
 0x368   : > { %v1042_v57 = vsel %vm398_vm1, 0.0, %v1041_v54  ;;  %v1047_v60 = vsel %vm398_vm1, %v1041_v54, %v1022_v47 }
 0x369   : > { %v1052_v61 = vrot.slane %v1042_v57, 4  ;;  %v1064_v62 = vsel %vm398_vm1, %v1063_v21, %v1044_v58  ;;  %v1051_v63 = vperm.slane %v1047_v60, %v1644_v26  ;;  %v1083_v1 = vrot.slane %v1062_v22, 4 }
 0x36a   : > { %v1068_v3 = vperm.slane %v1064_v62, %v1644_v26 }
 0x36b   : > { %v1053_v4 = vsel %vm398_vm1, %v1052_v61, %v1040_v2  ;;  %v1071_v5 = vrot.slane %v1051_v63, 4 }
 0x36c   : > { %v1057_v6 = vperm.slane %v1053_v4, %v1644_v26  ;;  %v1084_v7 = vsel %vm398_vm1, %v1068_v3, %v1083_v1  ;;  %v1081_v8 = vrot.slane %v1068_v3, 4 }
 0x36d   : > { %v1092_v9 = vperm.slane %v1084_v7, %v1659_v42 }
 0x36e   : > { %v1072_v10 = vsel %vm398_vm1, %v1057_v6, %v1071_v5  ;;  %v1069_v11 = vrot.slane %v1057_v6, 4  ;;  %v1082_v12 = vsel %vm398_vm1, %v1081_v8, %v1062_v22 }
 0x36f   : > { %v1080_v13 = vperm.slane %v1072_v10, %v1659_v42  ;;  %v1097_v14 = vrot.slane %v1092_v9, 4  ;;  %v1088_v15 = vperm.slane %v1082_v12, %v1659_v42 }
 0x370   : > { %v1070_v17 = vsel %vm398_vm1, %v1069_v11, %v1051_v63 }
 0x371   : > { %v1098_v18 = vsel %vm398_vm1, %v1097_v14, %v1080_v13  ;;  %v1076_v26 = vperm.slane %v1070_v17, %v1659_v42  ;;  %v1093_v19 = vrot.slane %v1088_v15, 4  ;;  %v1099_v24 = vrot.slane %v1080_v13, 4  ;;  %v1120_v42 = vld [vmem:[%s1919_s4 + $0x10] sm:$0xff] }
 0x372   : > { %1106 = vrot.lane.b32.xlu2 %v1098_v18, %s1482_s19  ;;  %1297 = vmatpush.xpose.msk.msra.mxu3 %vm295_vm0, %v1120_v42 }
 0x373   : > { %v1095_v20 = vrot.slane %v1076_v26, 4  ;;  %v1094_v23 = vsel %vm398_vm1, %v1093_v19, %v1076_v26  ;;  %v1100_v25 = vsel %vm398_vm1, %v1092_v9, %v1099_v24 }
 0x375   : > { %v1096_v55 = vsel %vm398_vm1, %v1088_v15, %v1095_v20 }
 0x376   : > { %1102 = vrot.lane.b32.xlu1 %v1096_v55, %s1483_s20  ;;  %1298 = vmatpush.xpose.msk.msra.mxu3 %vm295_vm0, %v1119_v27 }
 0x37a   : > { %1299 = vmatpush.xpose.msk.msra.mxu3 %vm295_vm0, %v1118_v28 }
 0x37e   : > { %1110 = vrot.lane.b32.xlu1 %v1100_v25, %s1484_s27  ;;  %s1174_s27 = scalar_lea.hbm %s1921_s6, %s1302_s8 }
 0x37f   : > { %s1178_s13 = sshll.u32 %s1174_s27, 4  ;;  %s1179_s13 = int_to_ptr.hbm [resolvable:$true] %s1178_s13 }
 0x380   : > { %s1410_s24 = sshra.s32 %s1179_s13, 4  ;;  %s1411_s24 = int_to_ptr.hbm [resolvable:$true] %s1410_s24 }
 0x381   : > { %s1412_s15 = scalar_lea.hbm %s1411_s24, 8  ;;  %p1417_p1 = scmp.lt.s32.totalorder %s1411_s24, %s1921_s6 }
 0x382   : > { %p1413_p12 = scmp.ne.s32.totalorder %s1411_s24, %s1412_s15  ;;  %p1418_p2 = scmp.lt.s32.totalorder %s1416_s18, %s1412_s15 }
 0x384   : > { %p1414_p13 = pnand %p1413_p12, %p1560_p4  ;;  %p1419_p3 = por %p1418_p2, %p1417_p1 }
 0x386   : > { %p1415_p0 = pneg %p1414_p13 }
 0x388   : > { %p1420_p5 = pnand %p1419_p3, %p1415_p0 }
 0x3cc   : > { %v1107_v59 = vpop.permute.xlu2 %1106 }
 0x3e8   : > { %v1103_v29 = vpop.permute.xlu1 %1102 }
 0x3e9   : > { %v1113_v30 = vsel %vm750_vm2, %v1094_v23, %v1103_v29 }
 0x3ea   : > { %v1115_v32 = vsel %vm1114_vm3, %v1113_v30, %v1107_v59 }
 0x3f0   : > { %v1111_v31 = vpop.permute.xlu1 %1110 }
 0x3f1   : > { %v1117_v33 = vsel %vm1116_vm4, %v1115_v32, %v1111_v31 }
 0x3f2   : > { %1300 = vmatmul.msk.f32.vlgmr.msra.gmra.mxu3 %vm295_vm0, %v1117_v33 }
 0x475   : > { %v1158_v34 = vpop.f32.mrf.mxu3 }
 0x476   : > { %v1159_v35 = vadd.f32 %v1379_v0, %v1158_v34 }
 0x478   : > { %1161 = vst.msk [vmem:[%s277_s11] sm:$0xff] %vm295_vm0, %v1159_v35 }
 0x479   : > { %1423 = shalt.err (!%p1420_p5)
}
 0x47a   : > { %1305 = dma.vmem_to_hbm [thread:$0]  (%p1560_p4), %s1177_s12, 128, %s1179_s13, %s1163_s14  }
 0x47b PF: > { %p1311_p6 = scmp.ge.s32.totalorder %s1474_s26, 2  ;;  %s1190_s17 = sand.u32 1, %s1454_s21  }
 0x47c   : > { %s1191_s27 = scalar_lea.sflag [#allocation3], %s1190_s17 }
 0x47d   : > { %p1308_p7 = pnand %p1311_p6, %p1567_p8 }
 0x47f   : > { %p1309_p9 = pneg %p1308_p7 }
 0x481   : > { %1449 = dma.done.wait (%p1309_p9), %s1191_s27, 128  }
 0x482   : > { %1451 = vsyncadd (%p1309_p9), %s1191_s27, 4294967168  ;;  %s19_s26 = sadd.s32 1, %s1474_s26   ;;  %s1924_s21 = smov %s1458_s22 }
 0x483   : > { %p16_p10 = scmp.ge.s32.totalorder %s19_s26, 4   ;;  %s1925_s22 = smov %s1462_s23 }
 0x484   : > { %s1926_s23 = smov %s1573_s10  ;;  %s1927_s24 = smov %s1470_s25 }
 0x485   : > { %s1928_s25 = smov %s1930_s29  ;;  %18 = sbr.rel (!%p16_p10) target bundleno = 4 (0x4), region = 82 }
 0x48a   :  { %1197 = vsyncpa [#allocation3], 1 }
 0x48b   :  { %1199 = vsyncpa [#allocation3 + $0x1], 1 }

</bundles_post_ra>
